<compile_context>
chip_gen: v5e
topology: v5e:2x2
jax: 0.10.0
libtpu: 0.0.40
codegen_flags: <defaults>
</compile_context>

<pallas_src>
import jax
import jax.numpy as jnp
from jax.experimental import pallas as pl
from jax.experimental.pallas import tpu as pltpu


def _round_up(x, m):
    return ((x + m - 1) // m) * m


def _choose_batch_tile(B):
    cap = 1024
    if B <= cap:
        # One tile covering the whole batch: block dim == full array dim, so
        # the (8,128) rule is satisfied for any B and nothing is padded.
        return B
    # Split into >= 2 tiles (keeps both v7x TensorCores busy) of <= 1024
    # 128-aligned rows; the ragged last tile is handled by Pallas.
    return min(cap, _round_up(pl.cdiv(B, 2), 128))


def _g2g_kernel(e1_ref, e2_ref, wt_ref, b_ref, out_ref):
    # e1_ref, e2_ref: (TB, D)  embedding tiles in natural [batch, feature] layout
    # wt_ref:         (D, D)   W^T (transposed once in the wrapper), resident
    # b_ref:          (1, D)   bias, resident
    # out_ref:        (TB, 1)  cosine similarities for this batch tile
    wt = wt_ref[...]
    b = b_ref[...]

    # Two MXU matmuls with f32 accumulation (no concat / extra VMEM copies).
    y1 = jnp.dot(e1_ref[...], wt, preferred_element_type=jnp.float32) + b
    y2 = jnp.dot(e2_ref[...], wt, preferred_element_type=jnp.float32) + b

    # Cosine similarity along the feature (lane) axis -> (TB, 1).
    dot = jnp.sum(y1 * y2, axis=1, keepdims=True)
    s1 = jnp.sum(y1 * y1, axis=1, keepdims=True)
    s2 = jnp.sum(y2 * y2, axis=1, keepdims=True)

    # PyTorch clamps each norm at eps=1e-8:
    #   dot / (max(||y1||,eps) * max(||y2||,eps))
    #     == dot * rsqrt(max(s1, eps^2) * max(s2, eps^2))
    eps2 = jnp.float32(1e-16)
    denom2 = jnp.maximum(s1, eps2) * jnp.maximum(s2, eps2)
    out_ref[...] = dot * jax.lax.rsqrt(denom2)


@jax.jit
def g2g_similarity(emb1, emb2, weight, bias):
    """emb1, emb2: [B, D]; weight: [D, D] (PyTorch layout out x in); bias: [D].
    Returns [B] cosine similarities of fc(emb1) vs fc(emb2)."""
    B, D = emb1.shape
    f32 = jnp.float32

    TB = _choose_batch_tile(B)
    n_tiles = pl.cdiv(B, TB)

    e1 = emb1.astype(f32)
    e2 = emb2.astype(f32)
    wt = weight.astype(f32).T            # one tiny (D x D) transpose, done once
    b = bias.astype(f32).reshape(1, D)

    cost = pl.CostEstimate(
        flops=4 * B * D * D + 8 * B * D,
        transcendentals=B,
        bytes_accessed=4 * (2 * B * D + D * D + D + B),
    )

    out = pl.pallas_call(
        _g2g_kernel,
        out_shape=jax.ShapeDtypeStruct((B, 1), f32),
        grid_spec=pltpu.PrefetchScalarGridSpec(
            num_scalar_prefetch=0,
            grid=(n_tiles,),
            in_specs=[
                pl.BlockSpec((TB, D), lambda i: (i, 0)),   # emb1 tile (streamed)
                pl.BlockSpec((TB, D), lambda i: (i, 0)),   # emb2 tile (streamed)
                pl.BlockSpec((D, D), lambda i: (0, 0)),    # W^T (resident)
                pl.BlockSpec((1, D), lambda i: (0, 0)),    # bias (resident)
            ],
            out_specs=pl.BlockSpec((TB, 1), lambda i: (i, 0)),
        ),
        compiler_params=pltpu.CompilerParams(
            dimension_semantics=("parallel",),   # batch tiles are independent
        ),
        cost_estimate=cost,
    )(e1, e2, wt, b)

    return out[:, 0]


def _reference(emb1, emb2, weight, bias):
    y1 = emb1 @ weight.T + bias
    y2 = emb2 @ weight.T + bias
    dot = jnp.sum(y1 * y2, axis=1)
    n1 = jnp.maximum(jnp.linalg.norm(y1, axis=1), 1e-8)
    n2 = jnp.maximum(jnp.linalg.norm(y2, axis=1), 1e-8)
    return dot / (n1 * n2)


if __name__ == "__main__":
    embedding_dim = 64
    batch = 8

    key = jax.random.PRNGKey(0)
    k1, k2, kw, kb = jax.random.split(key, 4)

    emb1 = jax.random.normal(k1, (batch, embedding_dim), dtype=jnp.float32)
    emb2 = jax.random.normal(k2, (batch, embedding_dim), dtype=jnp.float32)

    # Deterministic param init mimicking nn.Linear's uniform(-1/sqrt(D), 1/sqrt(D)).
    bound = 1.0 / (embedding_dim ** 0.5)
    weight = jax.random.uniform(kw, (embedding_dim, embedding_dim),
                                dtype=jnp.float32, minval=-bound, maxval=bound)
    bias = jax.random.uniform(kb, (embedding_dim,),
                              dtype=jnp.float32, minval=-bound, maxval=bound)

    out = g2g_similarity(emb1, emb2, weight, bias)
    jax.block_until_ready(out)

    ref = _reference(emb1, emb2, weight, bias)
    assert out.shape == (batch,)
    assert jnp.allclose(out, ref, atol=1e-5, rtol=1e-5), (out, ref)

    print("KERNEL_OK")
</pallas_src>

<mosaic_0001>
module attributes {stable_mosaic.version = 11 : i64} {
  func.func @_g2g_kernel(%arg0: i32, %arg1: memref<8x64xf32, #tpu.memory_space<vmem>>, %arg2: memref<8x64xf32, #tpu.memory_space<vmem>>, %arg3: memref<64x64xf32, #tpu.memory_space<vmem>>, %arg4: memref<1x64xf32, #tpu.memory_space<vmem>>, %arg5: memref<8x1xf32, #tpu.memory_space<vmem>>) attributes {dimension_semantics = [#tpu.dimension_semantics<parallel>], iteration_bounds = array<i64: 1>, scalar_prefetch = 0 : i64, scratch_operands = 0 : i64, tpu.core_type = #tpu.core_type<tc>, window_params = [{transform_indices = @transform_0, window_bounds = array<i64: 8, 64>}, {transform_indices = @transform_1, window_bounds = array<i64: 8, 64>}, {pipeline_mode = #tpu.pipeline_mode<synchronous>, transform_indices = @transform_2, window_bounds = array<i64: 64, 64>}, {pipeline_mode = #tpu.pipeline_mode<synchronous>, transform_indices = @transform_3, window_bounds = array<i64: 1, 64>}, {transform_indices = @transform_4, window_bounds = array<i64: 8, 1>}]} {
    %c0 = arith.constant 0 : index
    %c0_0 = arith.constant 0 : index
    %0 = vector.load %arg3[%c0, %c0_0] : memref<64x64xf32, #tpu.memory_space<vmem>>, vector<64x64xf32>
    %c0_1 = arith.constant 0 : index
    %c0_2 = arith.constant 0 : index
    %1 = vector.load %arg4[%c0_1, %c0_2] : memref<1x64xf32, #tpu.memory_space<vmem>>, vector<1x64xf32>
    %c0_3 = arith.constant 0 : index
    %c0_4 = arith.constant 0 : index
    %2 = vector.load %arg1[%c0_3, %c0_4] : memref<8x64xf32, #tpu.memory_space<vmem>>, vector<8x64xf32>
    %cst = arith.constant dense<0.000000e+00> : vector<8x64xf32>
    %3 = tpu.matmul %2, %0, %cst {dimension_numbers = #tpu.dot_dimension_numbers<[1], [0], [0], [1], [0, 0, 1, 1], [], []>} : vector<8x64xf32>, vector<64x64xf32>, vector<8x64xf32> -> vector<8x64xf32>
    %4 = vector.broadcast %1 : vector<1x64xf32> to vector<8x64xf32>
    %5 = arith.addf %3, %4 : vector<8x64xf32>
    %c0_5 = arith.constant 0 : index
    %c0_6 = arith.constant 0 : index
    %6 = vector.load %arg2[%c0_5, %c0_6] : memref<8x64xf32, #tpu.memory_space<vmem>>, vector<8x64xf32>
    %cst_7 = arith.constant dense<0.000000e+00> : vector<8x64xf32>
    %7 = tpu.matmul %6, %0, %cst_7 {dimension_numbers = #tpu.dot_dimension_numbers<[1], [0], [0], [1], [0, 0, 1, 1], [], []>} : vector<8x64xf32>, vector<64x64xf32>, vector<8x64xf32> -> vector<8x64xf32>
    %8 = vector.broadcast %1 : vector<1x64xf32> to vector<8x64xf32>
    %9 = arith.addf %7, %8 : vector<8x64xf32>
    %10 = arith.mulf %5, %9 : vector<8x64xf32>
    %cst_8 = arith.constant dense<0.000000e+00> : vector<8xf32>
    %11 = vector.multi_reduction <add>, %10, %cst_8 [1] : vector<8x64xf32> to vector<8xf32>
    %12 = vector.shape_cast %11 : vector<8xf32> to vector<8x1xf32>
    %13 = arith.mulf %5, %5 : vector<8x64xf32>
    %cst_9 = arith.constant dense<0.000000e+00> : vector<8xf32>
    %14 = vector.multi_reduction <add>, %13, %cst_9 [1] : vector<8x64xf32> to vector<8xf32>
    %15 = vector.shape_cast %14 : vector<8xf32> to vector<8x1xf32>
    %16 = arith.mulf %9, %9 : vector<8x64xf32>
    %cst_10 = arith.constant dense<0.000000e+00> : vector<8xf32>
    %17 = vector.multi_reduction <add>, %16, %cst_10 [1] : vector<8x64xf32> to vector<8xf32>
    %18 = vector.shape_cast %17 : vector<8xf32> to vector<8x1xf32>
    %cst_11 = arith.constant 1.000000e-16 : f32
    %19 = vector.broadcast %cst_11 : f32 to vector<8x1xf32>
    %20 = arith.maximumf %15, %19 : vector<8x1xf32>
    %cst_12 = arith.constant 1.000000e-16 : f32
    %21 = vector.broadcast %cst_12 : f32 to vector<8x1xf32>
    %22 = arith.maximumf %18, %21 : vector<8x1xf32>
    %23 = arith.mulf %20, %22 : vector<8x1xf32>
    %24 = math.rsqrt %23 : vector<8x1xf32>
    %25 = arith.mulf %12, %24 : vector<8x1xf32>
    %c0_13 = arith.constant 0 : index
    %c0_14 = arith.constant 0 : index
    %26 = vector.load %arg5[%c0_13, %c0_14] : memref<8x1xf32, #tpu.memory_space<vmem>>, vector<8x1xf32>
    tpu.vector_store %arg5[%c0_13, %c0_14], %25 {strides = array<i32>} : memref<8x1xf32, #tpu.memory_space<vmem>>, vector<8x1xf32>,
    return
  }
  func.func @transform_0(%arg0: i32) -> (i32, i32) {
    %c0_i32 = arith.constant 0 : i32
    %c0_i32_0 = arith.constant 0 : i32
    return %arg0, %c0_i32 : i32, i32
  }
  func.func @transform_1(%arg0: i32) -> (i32, i32) {
    %c0_i32 = arith.constant 0 : i32
    %c0_i32_0 = arith.constant 0 : i32
    return %arg0, %c0_i32 : i32, i32
  }
  func.func @transform_2(%arg0: i32) -> (i32, i32) {
    %c0_i32 = arith.constant 0 : i32
    %c0_i32_0 = arith.constant 0 : i32
    %c0_i32_1 = arith.constant 0 : i32
    return %c0_i32, %c0_i32_0 : i32, i32
  }
  func.func @transform_3(%arg0: i32) -> (i32, i32) {
    %c0_i32 = arith.constant 0 : i32
    %c0_i32_0 = arith.constant 0 : i32
    %c0_i32_1 = arith.constant 0 : i32
    return %c0_i32, %c0_i32_0 : i32, i32
  }
  func.func @transform_4(%arg0: i32) -> (i32, i32) {
    %c0_i32 = arith.constant 0 : i32
    %c0_i32_0 = arith.constant 0 : i32
    return %arg0, %c0_i32 : i32, i32
  }
}

</mosaic_0001>

<bundles_post_ra>
// kernel: g2g_similarity.1
= control target key start
LH: loop header
LB: loop body
LE: loop exit
PB: predicated region body
PF: predicated region fallthrough
CT: control target
= control target key end

     0   :  { %vm30_vm0 = vcmask 523264   ;;  %vm104_vm4 = vcmask 7168   ;;  %s181_s2 = inlined_call_operand.vmem [shape: f32[64,64], index: 2, kind: input, shape index: {}]   ;;  %s182_s3 = inlined_call_operand.vmem [shape: f32[1,64], index: 3, kind: input, shape index: {}]   ;;  %s183_s0 = inlined_call_operand.vmem [shape: f32[8,64], index: 0, kind: input, shape index: {}]   ;;  %s184_s1 = inlined_call_operand.vmem [shape: f32[8,64], index: 1, kind: input, shape index: {}]   ;;  %s185_s4 = inlined_call_operand.vmem [shape: f32[8,1], index: 4, kind: output, shape index: {}]  }
   0x1   :  { %v24_v0 = vld [vmem:[%s181_s2 + $0x38] sm:$0xff]  ;;  %v23_v1 = vld [vmem:[%s181_s2 + $0x30] sm:$0xff]  ;;  %v22_v2 = vld [vmem:[%s181_s2 + $0x28] sm:$0xff] }
   0x2   :  { %42 = vmatpush.msra.mxu0 %v24_v0  ;;  %66 = vmatpush.msra.mxu1 %v24_v0  ;;  %v21_v3 = vld [vmem:[%s181_s2 + $0x20] sm:$0xff]  ;;  %v20_v4 = vld [vmem:[%s181_s2 + $0x18] sm:$0xff]  ;;  %v19_v5 = vld [vmem:[%s181_s2 + $0x10] sm:$0xff] }
   0x3   :  { %v18_v6 = vld [vmem:[%s181_s2 + $0x8] sm:$0xff]  ;;  %v17_v7 = vld [vmem:[%s181_s2] sm:$0xff] }
   0x4   :  { %43 = vmatpush.msra.mxu0 %v23_v1  ;;  %67 = vmatpush.msra.mxu1 %v23_v1  ;;  %v26_v8 = vld [vmem:[%s183_s0] sm:$0xff] }
   0x5   :  { %v54_v9 = vld [vmem:[%s184_s1] sm:$0xff] }
   0x6   :  { %44 = vmatpush.msra.mxu0 %v22_v2  ;;  %68 = vmatpush.msra.mxu1 %v22_v2  ;;  %v112_v10 = vld [vmem:[%s182_s3] ss:$0 sm:$0xff] }
   0x8   :  { %45 = vmatpush.msra.mxu0 %v21_v3  ;;  %69 = vmatpush.msra.mxu1 %v21_v3 }
   0xa   :  { %46 = vmatpush.msra.mxu0 %v20_v4  ;;  %70 = vmatpush.msra.mxu1 %v20_v4 }
   0xc   :  { %47 = vmatpush.msra.mxu0 %v19_v5  ;;  %71 = vmatpush.msra.mxu1 %v19_v5 }
   0xe   :  { %48 = vmatpush.msra.mxu0 %v18_v6  ;;  %72 = vmatpush.msra.mxu1 %v18_v6 }
  0x10   :  { %49 = vmatpush.msra.mxu0 %v17_v7  ;;  %73 = vmatpush.msra.mxu1 %v17_v7 }
  0x11   :  { %110 = vmatmul.msk.f32.vlgmr.msra.gmra.mxu0 %vm30_vm0, %v26_v8  ;;  %111 = vmatmul.msk.f32.vlgmr.msra.gmra.mxu1 %vm30_vm0, %v54_v9 }
  0x8e   :  { %v51_v11 = vpop.f32.mrf.mxu0  ;;  %v75_v12 = vpop.f32.mrf.mxu1 }
  0x8f   :  { %v52_v13 = vadd.f32 %v112_v10, %v51_v11  ;;  %v76_v14 = vadd.f32 %v112_v10, %v75_v12 }
  0x91   :  { %v82_v15 = vmul.f32 %v52_v13, %v52_v13  ;;  %v78_v16 = vmul.f32 %v76_v14, %v52_v13  ;;  %v86_v19 = vmul.f32 %v76_v14, %v76_v14 }
  0x93   :  { %v83_v17 = vsel %vm30_vm0, %v82_v15, 0.0  ;;  %v79_v18 = vsel %vm30_vm0, %v78_v16, 0.0  ;;  %v87_v20 = vsel %vm30_vm0, %v86_v19, 0.0 }
  0x94   :  { %84 = vadd.xlane.f32.xlu0 %v83_v17  ;;  %80 = vadd.xlane.f32.xlu1 %v79_v18 }
  0x9c   :  { %88 = vadd.xlane.f32.xlu0 %v87_v20 }
 0x107   :  { %v85_v21 = vpop.xlane.xlu0 %84  ;;  %v81_v32 = vpop.xlane.xlu1 %80 }
 0x108   :  { %v90_v23 = vmax.f32 %v85_v21, 1e-16 }
 0x10f   :  { %v89_v22 = vpop.xlane.xlu0 %88 }
 0x110   :  { %v91_v24 = vmax.f32 %v89_v22, 1e-16 }
 0x112   :  { %v92_v25 = vmul.f32 %v91_v24, %v90_v23 }
 0x114   :  { %113 = vrsqrt.f32 %v92_v25  ;;  %vm99_vm2 = vweird.f32 %v92_v25 }
 0x11a   :  { %v114_v26 = vpop.eup %113 }
 0x11b   :  { %v94_v27 = vmul.f32 %v114_v26, %v92_v25  ;;  %vm100_vm1 = vweird.f32 %v114_v26 }
 0x11c   :  { %vm101_vm3 = vmor %vm99_vm2, %vm100_vm1 }
 0x11d   :  { %v95_v28 = vmul.f32 %v114_v26, %v94_v27 }
 0x11f   :  { %v96_v29 = vmul.f32 0.5, %v95_v28 }
 0x121   :  { %v97_v30 = vsub.f32 1.5, %v96_v29 }
 0x123   :  { %v98_v31 = vmul.f32 %v114_v26, %v97_v30 }
 0x125   :  { %v102_v33 = vsel %vm101_vm3, %v114_v26, %v98_v31 }
 0x126   :  { %v103_v34 = vmul.f32 %v102_v33, %v81_v32 }
 0x128   :  { %105 = vst.msk [vmem:[%s185_s4] sm:$0xff] %vm104_vm4, %v103_v34 }

</bundles_post_ra>
